<compile_context>
chip_gen: v7x
topology: tpu7x:2x2x1
jax: 0.10.0
libtpu: 0.0.40
codegen_flags: <defaults>
</compile_context>

<pallas_src>
import functools

import jax
import jax.numpy as jnp
from jax.experimental import pallas as pl
from jax.experimental.pallas import tpu as pltpu


# --------------------------------------------------------------------------
# Fast path: lane-aligned chunked split (grid over batch_size-wide chunks).
# Chunk 0 is the positive block; chunks 1..C-1 are the negatives.
# --------------------------------------------------------------------------
def _split_chunk_kernel(trip_ref, pos_ref, neg_ref):
    c = pl.program_id(0)

    @pl.when(c == 0)
    def _():
        pos_ref[...] = trip_ref[...]          # full-tile copy, unmasked stores

    @pl.when(c > 0)
    def _():
        neg_ref[...] = trip_ref[...]          # full-tile copy, unmasked stores


def _split_aligned(triples, batch_size):
    three, seq = triples.shape
    neg = seq - batch_size
    n_chunks = seq // batch_size
    return pl.pallas_call(
        _split_chunk_kernel,
        out_shape=(
            jax.ShapeDtypeStruct((three, batch_size), triples.dtype),
            jax.ShapeDtypeStruct((three, neg), triples.dtype),
        ),
        grid=(n_chunks,),
        in_specs=[pl.BlockSpec((three, batch_size), lambda c: (0, c))],
        out_specs=(
            # Positive output is written only at chunk 0 and stays resident.
            pl.BlockSpec((three, batch_size), lambda c: (0, 0)),
            # Negative output: chunk c (c >= 1) lands in block c-1; the c == 0
            # step maps to block 0 but does not write (overwritten at c == 1
            # before any writeback).
            pl.BlockSpec((three, batch_size),
                         lambda c: (0, jnp.maximum(c - 1, 0))),
        ),
        compiler_params=pltpu.CompilerParams(
            dimension_semantics=("arbitrary",)),
    )(triples)


# --------------------------------------------------------------------------
# Fallback path: whole-array block, in-kernel split (unaligned batch_size).
# --------------------------------------------------------------------------
def _split_whole_kernel(trip_ref, pos_ref, neg_ref, *, batch_size):
    trip = trip_ref[...]                       # (3, S) in VMEM
    pos_ref[...] = trip[:, :batch_size]
    neg_ref[...] = trip[:, batch_size:]


def _split_fallback(triples, batch_size):
    three, seq = triples.shape
    neg = seq - batch_size
    kernel = functools.partial(_split_whole_kernel, batch_size=batch_size)
    return pl.pallas_call(
        kernel,
        out_shape=(
            jax.ShapeDtypeStruct((three, batch_size), triples.dtype),
            jax.ShapeDtypeStruct((three, neg), triples.dtype),
        ),
        grid=(1,),
        in_specs=[pl.BlockSpec((three, seq), lambda i: (0, 0))],
        out_specs=(
            pl.BlockSpec((three, batch_size), lambda i: (0, 0)),
            pl.BlockSpec((three, neg), lambda i: (0, 0)),
        ),
        compiler_params=pltpu.CompilerParams(
            dimension_semantics=("arbitrary",)),
    )(triples)


# --------------------------------------------------------------------------
# Wrapper implementing the Model.get_* semantics.
# --------------------------------------------------------------------------
def model_batch_views(triples, labels, batch_size):
    """triples: (3, S) int32 rows = (batch_h, batch_t, batch_r);
    labels: (S,) float32 = batch_y.
    Returns (positive_htr, negative_htr, all_htr, batch_y)."""
    three, seq = triples.shape
    assert three == 3
    neg = seq - batch_size

    # get_all_instance() / get_all_labels() are pure pass-throughs: return the
    # inputs directly instead of round-tripping them through VMEM.
    all_htr = triples
    batch_y = labels

    if neg <= 0:
        # No negatives: avoid a zero-size (3, 0) output block in the kernel.
        return triples, triples[:, :0], all_htr, batch_y

    if batch_size % 128 == 0 and seq % batch_size == 0:
        pos, negt = _split_aligned(triples, batch_size)
    else:
        pos, negt = _split_fallback(triples, batch_size)
    return pos, negt, all_htr, batch_y


if __name__ == "__main__":
    key = jax.random.PRNGKey(0)

    def make_batch(batch_size, negative_ent, negative_rel, n_ent, n_rel, k):
        seq = batch_size * (1 + negative_ent + negative_rel)
        kh, kt, kr = jax.random.split(k, 3)
        batch_h = jax.random.randint(kh, (seq,), 0, n_ent, jnp.int32)
        batch_t = jax.random.randint(kt, (seq,), 0, n_ent, jnp.int32)
        batch_r = jax.random.randint(kr, (seq,), 0, n_rel, jnp.int32)
        batch_y = jnp.concatenate(
            [jnp.ones((batch_size,), jnp.float32),
             -jnp.ones((seq - batch_size,), jnp.float32)])
        return jnp.stack([batch_h, batch_t, batch_r], axis=0), batch_y

    k1, k2 = jax.random.split(key)

    # 1) Lane-aligned fast path: batch_size=128, negative_ent=1 -> S=256.
    B1 = 128
    triples1, y1 = make_batch(B1, 1, 0, 1000, 20, k1)
    pos1, neg1, all1, lab1 = model_batch_views(triples1, y1, B1)
    jax.block_until_ready((pos1, neg1, all1, lab1))
    assert jnp.array_equal(pos1, triples1[:, :B1])
    assert jnp.array_equal(neg1, triples1[:, B1:])
    assert jnp.array_equal(all1, triples1)
    assert jnp.array_equal(lab1, y1)

    # 2) Unaligned fallback path: batch_size=8, negative_ent=2 -> S=24.
    B2 = 8
    triples2, y2 = make_batch(B2, 2, 0, 32, 4, k2)
    pos2, neg2, all2, lab2 = model_batch_views(triples2, y2, B2)
    jax.block_until_ready((pos2, neg2, all2, lab2))
    assert jnp.array_equal(pos2, triples2[:, :B2])
    assert jnp.array_equal(neg2, triples2[:, B2:])
    assert jnp.array_equal(all2, triples2)
    assert jnp.array_equal(lab2, y2)

    print("KERNEL_OK")
</pallas_src>

<mosaic_0001>
module attributes {stable_mosaic.version = 11 : i64} {
  func.func @_split_chunk_kernel(%arg0: i32, %arg1: memref<3x128xi32, #tpu.memory_space<vmem>>, %arg2: memref<3x128xi32, #tpu.memory_space<vmem>>, %arg3: memref<3x128xi32, #tpu.memory_space<vmem>>) attributes {dimension_semantics = [#tpu.dimension_semantics<arbitrary>], iteration_bounds = array<i64: 2>, scalar_prefetch = 0 : i64, scratch_operands = 0 : i64, tpu.core_type = #tpu.core_type<tc>, window_params = [{transform_indices = @transform_0, window_bounds = array<i64: 3, 128>}, {pipeline_mode = #tpu.pipeline_mode<synchronous>, transform_indices = @transform_1, window_bounds = array<i64: 3, 128>}, {transform_indices = @transform_2, window_bounds = array<i64: 3, 128>}]} {
    %c0_i32 = arith.constant 0 : i32
    %0 = arith.cmpi eq, %arg0, %c0_i32 : i32
    %1 = arith.extui %0 : i1 to i32
    %c0_i32_0 = arith.constant 0 : i32
    %2 = arith.cmpi ne, %1, %c0_i32_0 : i32
    scf.if %2 {
      %c0 = arith.constant 0 : index
      %c0_3 = arith.constant 0 : index
      %6 = vector.load %arg1[%c0, %c0_3] : memref<3x128xi32, #tpu.memory_space<vmem>>, vector<3x128xi32>
      %c0_4 = arith.constant 0 : index
      %c0_5 = arith.constant 0 : index
      %7 = vector.load %arg2[%c0_4, %c0_5] : memref<3x128xi32, #tpu.memory_space<vmem>>, vector<3x128xi32>
      tpu.vector_store %arg2[%c0_4, %c0_5], %6 {strides = array<i32>} : memref<3x128xi32, #tpu.memory_space<vmem>>, vector<3x128xi32>,
    } else {
    }
    %c0_i32_1 = arith.constant 0 : i32
    %3 = arith.cmpi sgt, %arg0, %c0_i32_1 : i32
    %4 = arith.extui %3 : i1 to i32
    %c0_i32_2 = arith.constant 0 : i32
    %5 = arith.cmpi ne, %4, %c0_i32_2 : i32
    scf.if %5 {
      %c0 = arith.constant 0 : index
      %c0_3 = arith.constant 0 : index
      %6 = vector.load %arg1[%c0, %c0_3] : memref<3x128xi32, #tpu.memory_space<vmem>>, vector<3x128xi32>
      %c0_4 = arith.constant 0 : index
      %c0_5 = arith.constant 0 : index
      %7 = vector.load %arg3[%c0_4, %c0_5] : memref<3x128xi32, #tpu.memory_space<vmem>>, vector<3x128xi32>
      tpu.vector_store %arg3[%c0_4, %c0_5], %6 {strides = array<i32>} : memref<3x128xi32, #tpu.memory_space<vmem>>, vector<3x128xi32>,
    } else {
    }
    return
  }
  func.func @transform_0(%arg0: i32) -> (i32, i32) {
    %c0_i32 = arith.constant 0 : i32
    %c0_i32_0 = arith.constant 0 : i32
    return %c0_i32, %arg0 : i32, i32
  }
  func.func @transform_1(%arg0: i32) -> (i32, i32) {
    %c0_i32 = arith.constant 0 : i32
    %c0_i32_0 = arith.constant 0 : i32
    %c0_i32_1 = arith.constant 0 : i32
    return %c0_i32, %c0_i32_0 : i32, i32
  }
  func.func @transform_2(%arg0: i32) -> (i32, i32) {
    %c1_i32 = arith.constant 1 : i32
    %0 = arith.subi %arg0, %c1_i32 : i32
    %c0_i32 = arith.constant 0 : i32
    %1 = arith.maxsi %0, %c0_i32 : i32
    %c0_i32_0 = arith.constant 0 : i32
    %c0_i32_1 = arith.constant 0 : i32
    return %c0_i32_0, %1 : i32, i32
  }
}

</mosaic_0001>

<bundles_post_ra>
// kernel: tpu_custom_call.1
= control target key start
LH: loop header
LB: loop body
LE: loop exit
PB: predicated region body
PF: predicated region fallthrough
CT: control target
= control target key end

     0   :  { %8 = vsyncpa [#allocation3], 0  ;;  %s775_s0 = inlined_call_operand.hbm [shape: s32[3,256], index: 0, kind: input, shape index: {}]   ;;  %s776_s1 = inlined_call_operand.hbm [shape: s32[3,128], index: 1, kind: output, shape index: {0}]   ;;  %s777_s2 = inlined_call_operand.hbm [shape: s32[3,128], index: 2, kind: output, shape index: {1}]  }
   0x1   :  { %10 = vsyncpa [#allocation3 + $0x1], 0 }
   0x2   :  { %11 = vsyncpa [#allocation4], 0 }
   0x3   :  { %12 = vsyncpa [#allocation7], 0 }
   0x4   :  { %14 = vsyncpa [#allocation7 + $0x1], 0  ;;  %s556_s9 = smov 0   ;;  %s558_s10 = smov 0  }
   0x5   :  { %s560_s11 = smov 0   ;;  %s562_s12 = smov 0  }
   0x6   :  { %s564_s13 = smov 0   ;;  %s566_s14 = smov 0  }
   0x7   :  { %s568_s15 = smov 0  }
   0x8 LB: > { %s590_s16 = sadd.s32 4294967295, %s536_s15   ;;  %s290_s17 = sadd.s32 4294967294, %s536_s15   ;;  %s536_s15 = sphi %s568_s15, %s801_s15   ;;  %s532_s14 = sphi %s566_s14, %s800_s14   ;;  %s528_s13 = sphi %s564_s13, %s799_s13   ;;  %s524_s12 = sphi %s562_s12, %s798_s12   ;;  %s520_s11 = sphi %s560_s11, %s797_s11   ;;  %s516_s10 = sphi %s558_s10, %s796_s10   ;;  %s512_s9 = sphi %s556_s9, %s795_s9  }
   0x9   : > { %s594_s18 = sadd.s32 1, %s536_s15   ;;  %s27_s19 = sadd.s32 1, %s532_s14 }
   0xa   : > { %s24_s20 = ssub.s32 %s536_s15, %s594_s18  ;;  %p34_p0 = scmp.ne.s32.totalorder %s532_s14, %s528_s13 }
   0xb   : > { %p25_p1 = scmp.eq.s32.totalorder %s24_s20, 0  ;;  %p35_p2 = scmp.eq.s32.totalorder %s536_s15, 0 }
   0xc   : > { %p40_p3 = scmp.ne.s32.totalorder %s528_s13, %s524_s12  ;;  %p41_p4 = scmp.eq.s32.totalorder %s590_s16, 0 }
   0xd   : > { %s605_s21 = scalar_select %p25_p1, %s532_s14, %s27_s19  }
   0xe   : > { %p607_p5 = por %p35_p2, %p34_p0  ;;  %p611_p6 = por %p41_p4, %p40_p3 }
   0xf   : > { %p72_p7 = scmp.gt.s32.totalorder %s590_s16, 0  ;;  %s292_s24 = sadd.s32 4294967295, %s594_s18 }
  0x10   : > { %p75_p8 = scmp.gt.s32.totalorder %s292_s24, 0  ;;  %s80_s25 = sadd.s32 1, %s520_s11 }
  0x11   : > { %s73_s26 = scalar_select %p72_p7, %s590_s16, 0 }
  0x12   : > { %s803_s24 = smov (!%p75_p8, %s292_s24), 0  ;;  %p90_p9 = scmp.ne.s32.totalorder %s520_s11, %s516_s10 }
  0x13   : > { %p778_p10 = scmp.eq.s32.totalorder %s590_s16, 1  ;;  %s77_s27 = ssub.s32 %s73_s26, %s803_s24 }
  0x14   : > { %p96_p11 = scmp.ne.s32.totalorder %s516_s10, %s512_s9  ;;  %p78_p12 = scmp.eq.s32.totalorder %s77_s27, 0 }
  0x15   : > { %p626_p13 = por %p778_p10, %p90_p9  ;;  %p97_p0 = scmp.eq.s32.totalorder %s290_s17, 1 }
  0x16   : > { %s632_s29 = scalar_select %p78_p12, %s520_s11, %s80_s25  }
  0x17   : > { %s782_s28 = scalar_select %p626_p13, 1, 0 }
  0x18   : > { %p634_p2 = por %p97_p0, %p96_p11  ;;  %p325_p3 = scmp.lt.s32.totalorder %s536_s15, 2 }
  0x19   : > { %s117_s3 = sand.u32 1, %s532_s14   ;;  %s296_s4 = sshll.u32 %s536_s15, 6 }
  0x1a   : > { %s783_s30 = scalar_select %p634_p2, 1, 0 }
  0x1b   : > { %s295_s5 = sshll.u32 %s117_s3, 2  ;;  %s644_s8 = scalar_lea.hbm %s775_s0, %s296_s4 }
  0x1c   : > { %s121_s12 = scalar_lea.vmem [#allocation2], %s295_s5  ;;  %p648_p4 = pnand %p325_p3, %p607_p5 }
  0x1d   : > { %s128_s17 = sshll.u32 %s121_s12, 4  ;;  %s118_s20 = scalar_lea.sflag [#allocation3], %s117_s3  ;;  %s652_s17 = int_to_ptr.vmem [resolvable:$true] %s128_s17 }
  0x1e   : > { %s386_s24 = scalar_lea.hbm %s644_s8, 64  ;;  %p388_p11 = pneg %p648_p4 }
  0x1f   : > { %p387_p9 = scmp.ne.s32.totalorder %s644_s8, %s386_s24  ;;  %s391_s26 = scalar_lea.hbm %s775_s0, 128 }
  0x20   : > { %p392_p5 = scmp.lt.u32.totalorder %s644_s8, %s775_s0  ;;  %p393_p3 = scmp.lt.u32.totalorder %s391_s26, %s386_s24 }
  0x21   : > { %p389_p12 = pnand %p388_p11, %p387_p9  ;;  %p395_p10 = scmp.lt.u32.totalorder %s386_s24, %s644_s8 }
  0x22   : > { %p394_p1 = por %p393_p3, %p392_p5 }
  0x23   : > { %p390_p0 = pneg %p389_p12 }
  0x24   : > { %p396_p7 = por %p395_p10, %p394_p1 }
  0x26   : > { %p397_p8 = pnand %p396_p7, %p390_p0 }
  0x28   : > { %400 = shalt.err (!%p397_p8)
}
  0x29   : > { %s401_s3 = scalar_lea.vmem %s652_s17, 64  ;;  %s538_s5 = smov [#allocation2]  }
  0x2a   : > { %p402_p9 = scmp.ne.s32.totalorder %s652_s17, %s401_s3  ;;  %s406_s6 = sshll.u32 %s538_s5, 4  ;;  %s407_s6 = int_to_ptr.vmem [resolvable:$false] %s406_s6 }
  0x2b   : > { %s408_s7 = scalar_lea.vmem %s407_s6, 128  ;;  %p409_p13 = scmp.lt.s32.totalorder %s652_s17, %s407_s6 }
  0x2c   : > { %p404_p12 = pnand %p402_p9, %p388_p11  ;;  %p410_p5 = scmp.lt.s32.totalorder %s408_s7, %s401_s3 }
  0x2e   : > { %p405_p2 = pneg %p404_p12  ;;  %p411_p3 = por %p410_p5, %p409_p13 }
  0x30   : > { %p412_p10 = pnand %p411_p3, %p405_p2 }
  0x32   : > { %415 = shalt.err (!%p412_p10)
}
  0x33   : > { %320 = dma.hbm_to_vmem [thread:$0]  (!%p648_p4), %s644_s8, 64, %s652_s17, %s118_s20  }
  0x34   : > { %p785_p1 = scmp.lt.s32.totalorder %s536_s15, 3  ;;  %p786_p7 = scmp.ge.s32.totalorder %s536_s15, 1 }
  0x36   : > { %p134_p8 = pnand %p786_p7, %p785_p1 }
  0x37   : > { %s139_s12 = sand.u32 (!%p134_p8), 1, %s528_s13  }
  0x38   : > { %137 = sbr.rel (%p134_p8) target bundleno = 137 (0x89), region = 24  ;;  %s298_s24 = sshll.u32 (!%p134_p8), %s139_s12, 2 }
  0x39   : > { %s140_s22 = scalar_lea.sflag (!%p134_p8), [#allocation3], %s139_s12  ;;  %s143_s25 = scalar_lea.vmem (!%p134_p8), [#allocation2], %s298_s24 }
  0x3f   : > { %499 = dma.done.wait (%p611_p6), %s140_s22, 64  }
  0x40   : > { %501 = vsyncadd (%p611_p6), %s140_s22, 4294967232  ;;  %s161_s19 = sand.u32 1, %s516_s10   ;;  %p300_p13 = scmp.ne.s32.totalorder %s590_s16, 0 }
  0x41   : > { %s693_s8 = sshll.u32 %s161_s19, 2  ;;  %v171_v0 = vld [vmem:[%s143_s25] sm:$0x7] (!%p300_p13) }
  0x42   : > { %s163_s17 = scalar_lea.vmem [#allocation6], %s693_s8  ;;  %170 = sbr.rel (%p300_p13) target bundleno = 73 (0x49), region = 32  ;;  %172 = vst [vmem:[#allocation5] sm:$0x7] (!%p300_p13), %v171_v0 }
  0x49 PF: > { %p301_p2 = scmp.le.s32.totalorder %s590_s16, 0 }
  0x4a   : > { %v177_v1 = vld [vmem:[%s143_s25] sm:$0x7] (!%p301_p2) }
  0x4b   : > { %176 = sbr.rel (%p301_p2) target bundleno = 82 (0x52), region = 36  ;;  %178 = vst [vmem:[%s163_s17] sm:$0x7] (!%p301_p2), %v177_v1 }
  0x52 PF: > { %s539_s23 = smov [#allocation5]   ;;  %s304_s26 = sadd.s32 4294967295, %s590_s16 }
  0x53   : > { %s191_s20 = sshll.u32 %s539_s23, 4  ;;  %p787_p4 = scmp.eq.s32.totalorder %s590_s16, 1  ;;  %s192_s20 = int_to_ptr.vmem [resolvable:$true] %s191_s20 }
  0x54   : > { %s416_s27 = scalar_lea.vmem %s192_s20, 64  ;;  %p423_p9 = scmp.lt.s32.totalorder %s192_s20, %s192_s20 }
  0x55   : > { %p417_p6 = scmp.ne.s32.totalorder %s192_s20, %s416_s27  ;;  %p424_p12 = scmp.lt.s32.totalorder %s416_s27, %s416_s27 }
  0x57   : > { %p418_p11 = pnand %p417_p6, %p787_p4  ;;  %p425_p5 = por %p424_p12, %p423_p9 }
  0x59   : > { %p419_p0 = pneg %p418_p11 }
  0x5b   : > { %p426_p3 = pnand %p425_p5, %p419_p0 }
  0x5d   : > { %429 = shalt.err (!%p426_p3)
}
  0x5e   : > { %s430_s5 = scalar_lea.hbm %s776_s1, 64  ;;  %p788_p1 = pmov %p787_p4 }
  0x5f   : > { %p431_p10 = scmp.ne.s32.totalorder %s776_s1, %s430_s5  ;;  %p436_p13 = scmp.lt.u32.totalorder %s430_s5, %s776_s1 }
  0x61   : > { %p432_p7 = pnand %p431_p10, %p788_p1 }
  0x63   : > { %p433_p8 = pneg %p432_p7 }
  0x65   : > { %p438_p2 = pnand %p436_p13, %p433_p8 }
  0x67   : > { %441 = shalt.err (!%p438_p2)
}
  0x68   : > { %p789_p6 = pmov %p788_p1  ;;  %p199_p4 = scmp.gt.s32.totalorder %s304_s26, 0 }
  0x69   : > { %s207_s23 = sshll.u32 %s163_s17, 4  ;;  %s180_s6 = scalar_lea.sflag [#allocation7], %s161_s19  ;;  %s721_s23 = int_to_ptr.vmem [resolvable:$true] %s207_s23 }
  0x6a   : > { %312 = dma.vmem_to_hbm [thread:$0]  (%p789_p6), %s192_s20, 64, %s776_s1, [#allocation4]  }
  0x6b   : > { %s805_s26 = smov (!%p199_p4, %s304_s26), 0  ;;  %s442_s7 = scalar_lea.vmem %s721_s23, 64 }
  0x6c   : > { %s305_s27 = sshll.u32 %s805_s26, 6  ;;  %p443_p11 = scmp.ne.s32.totalorder %s721_s23, %s442_s7 }
  0x6d   : > { %s205_s5 = scalar_lea.hbm %s777_s2, %s305_s27  ;;  %p790_p0 = scmp.ne.s32.totalorder %s782_s28, 0 }
  0x6e   : > { %s540_s8 = smov [#allocation6]  }
  0x6f   : > { %p444_p9 = pnand %p443_p11, %p790_p0  ;;  %s446_s17 = sshll.u32 %s540_s8, 4  ;;  %s447_s17 = int_to_ptr.vmem [resolvable:$false] %s446_s17 }
  0x70   : > { %s448_s20 = scalar_lea.vmem %s447_s17, 128  ;;  %p449_p5 = scmp.lt.s32.totalorder %s721_s23, %s447_s17 }
  0x71   : > { %p445_p12 = pneg %p444_p9  ;;  %p450_p3 = scmp.lt.s32.totalorder %s448_s20, %s442_s7 }
  0x73   : > { %p451_p10 = por %p450_p3, %p449_p5 }
  0x75   : > { %p452_p1 = pnand %p451_p10, %p445_p12 }
  0x77   : > { %455 = shalt.err (!%p452_p1)
}
  0x78   : > { %s456_s26 = scalar_lea.hbm %s205_s5, 64  ;;  %s460_s24 = scalar_lea.hbm %s777_s2, 64 }
  0x79   : > { %p457_p7 = scmp.ne.s32.totalorder %s205_s5, %s456_s26  ;;  %p461_p2 = scmp.lt.u32.totalorder %s205_s5, %s777_s2 }
  0x7a   : > { %p462_p6 = scmp.lt.u32.totalorder %s460_s24, %s456_s26  ;;  %p464_p11 = scmp.lt.u32.totalorder %s456_s26, %s205_s5 }
  0x7b   : > { %p458_p8 = pnand %p457_p7, %p790_p0 }
  0x7c   : > { %p463_p4 = por %p462_p6, %p461_p2 }
  0x7d   : > { %p459_p13 = pneg %p458_p8 }
  0x7e   : > { %p465_p9 = por %p464_p11, %p463_p4 }
  0x80   : > { %p466_p12 = pnand %p465_p9, %p459_p13 }
  0x82   : > { %469 = shalt.err (!%p466_p12)
}
  0x83   : > { %313 = dma.vmem_to_hbm [thread:$0]  (%p790_p0), %s721_s23, 64, %s205_s5, %s180_s6  }
  0x84   : > { %p791_p5 = scmp.eq.s32.totalorder %s590_s16, 1 }
  0x86   : > { %503 = dma.done.wait (%p791_p5), [#allocation4], 64   ;;  %p792_p3 = pmov %p791_p5 }
  0x88   : > { %505 = vsyncadd (%p792_p3), [#allocation4], 4294967232 }
  0x89 PF: > { %s223_s27 = sand.u32 1, %s512_s9   ;;  %p793_p10 = scmp.ne.s32.totalorder %s783_s30, 0 }
  0x8a   : > { %p794_p1 = scmp.ge.s32.totalorder %s536_s15, 2  ;;  %s224_s4 = scalar_lea.sflag [#allocation7], %s223_s27 }
  0x8c   : > { %p322_p7 = pnand %p794_p1, %p793_p10 }
  0x8e   : > { %507 = dma.done.wait (!%p322_p7), %s224_s4, 64  }
  0x8f   : > { %509 = vsyncadd (!%p322_p7), %s224_s4, 4294967232  ;;  %p17_p0 = scmp.ge.s32.totalorder %s594_s18, 4   ;;  %s795_s9 = smov %s516_s10 }
  0x90   : > { %s796_s10 = smov %s520_s11  ;;  %s797_s11 = smov %s632_s29 }
  0x91   : > { %s798_s12 = smov %s528_s13  ;;  %s799_s13 = smov %s532_s14 }
  0x92   : > { %s800_s14 = smov %s605_s21  ;;  %s801_s15 = smov %s594_s18 }
  0x93   :  { %19 = sbr.rel (!%p17_p0) target bundleno = 8 (0x8), region = 86 }
  0x9a   :  { %229 = vsyncpa [#allocation3], 1 }
  0x9b   :  { %231 = vsyncpa [#allocation3 + $0x1], 1 }
  0x9c   :  { %232 = vsyncpa [#allocation4], 1 }
  0x9d   :  { %234 = vsyncpa [#allocation4 + $0x1], 1 }
  0x9e   :  { %235 = vsyncpa [#allocation7], 1 }
  0x9f   :  { %237 = vsyncpa [#allocation7 + $0x1], 1 }

</bundles_post_ra>
